<compile_context>
chip_gen: v6e
topology: v6e:2x2x1
jax: 0.10.0
libtpu: 0.0.40
codegen_flags: <defaults>
</compile_context>

<pallas_src>
import functools
import numpy as np
import jax
import jax.numpy as jnp
from jax.experimental import pallas as pl
from jax.experimental.pallas import tpu as pltpu

# Constants copied verbatim from the PyTorch module (note: ALPHA_2_SQ is
# ALPHA**2 in the original source -- kept identical on purpose).
ALPHA = float(4.0 - 2.0 * np.sqrt(2))
ALPHA_2 = float(8.0 - 4.0 * np.sqrt(2))
ALPHA_2_SQ = float(ALPHA ** 2.0)
ALPHA_SQ = float(ALPHA ** 2.0)
BETA = -float(np.log(np.sqrt(2) + 1))
BETA_2 = -float(0.5 * np.log(np.sqrt(2) + 1))
ETA_SQ = float(np.pi / 8.0)

# Folded constants so every sigmoid becomes a single tanh and the 1/2 & ALPHA
# factors live inside the rsqrt argument (exact identities):
#   sigmoid(x * kappa(s))                    = 0.5 + 0.5*tanh(x * rsqrt(4 + 4*ETA_SQ*s))
#   sigmoid((x+B)*ALPHA*kappa(s, ALPHA_SQ))  = 0.5 + 0.5*tanh((x+B) * rsqrt(4/ALPHA_SQ + 4*ETA_SQ*s))
#   2*sigmoid(x*kappa(s, 0.25)) - 1          =       tanh(x * rsqrt(1 + 4*ETA_SQ*s))
#   4*sigmoid((x+B2)*ALPHA_2*kappa(s, A2SQ)) = 2 + 2*tanh((x+B2)*rsqrt(4/ALPHA_2^2 + 4*A2SQ*ETA_SQ/ALPHA_2^2 * s))
FOUR_ETA_SQ = 4.0 * ETA_SQ
SIG_M_CONST = 4.0
SIG_S_CONST = 4.0 / ALPHA_SQ
TANH_M_CONST = 1.0
TANH_S_CONST = 4.0 / (ALPHA_2 ** 2)
TANH_S_COEF = 4.0 * ALPHA_2_SQ * ETA_SQ / (ALPHA_2 ** 2)

LANE = 128
SUBLANE = 8
MAX_TILE_ROWS_1CORE = 1024   # 4 arrays x 2 bufs x 1024x128x4B = 4 MiB
MAX_TILE_ROWS_MULTI = 2048   # 8 MiB double-buffered: under every scoped-VMEM default
MIN_TILE_ROWS_MULTI = 512
DEFAULT_MIN_PALLAS_ELEMENTS = 65536


def _round_up(x, m):
    return ((x + m - 1) // m) * m


def _num_tensorcores():
    """Number of TensorCores a single pallas_call can shard a 'parallel' grid
    axis across (2 on v7x-style megacore parts, 1 on v5e/v6e)."""
    try:
        info = pltpu.get_tpu_info()
        for attr in ("num_cores", "core_count", "num_tensorcores",
                     "tensorcore_count", "num_tensor_cores"):
            v = getattr(info, attr, None)
            if isinstance(v, int) and v > 0:
                return v
    except Exception:
        pass
    try:
        v = getattr(jax.devices()[0], "num_cores", None)
        if isinstance(v, int) and v > 0:
            return v
    except Exception:
        pass
    return 1


def _choose_tile_rows(rows, num_cores):
    """rows is a multiple of SUBLANE."""
    if num_cores <= 1:
        # Single TensorCore: one big tile; multi-step grid only when the data
        # naturally exceeds the tile (keeps double-buffering for large inputs,
        # avoids pure per-step overhead for small/medium ones).
        return min(rows, MAX_TILE_ROWS_1CORE)
    # Multi-TensorCore: aim for >= ~2 steps per core so each core's
    # double-buffering can overlap DMA with compute, but never shrink below
    # 512 rows (per-step overhead would dominate the ~1us of HBM time/step).
    tr = _round_up(pl.cdiv(rows, 2 * num_cores), SUBLANE)
    tr = max(tr, MIN_TILE_ROWS_MULTI)
    tr = min(tr, MAX_TILE_ROWS_MULTI, rows)
    return max(tr, SUBLANE)


def _npn_math(o_m, o_s, activation):
    """Shared forward math (used by both the Pallas kernel body and the
    small-input fused-XLA fast path).  2 rsqrt + 2 tanh per element."""
    if activation == "sigmoid":
        a_m = 0.5 * jnp.tanh(o_m * jax.lax.rsqrt(SIG_M_CONST + FOUR_ETA_SQ * o_s)) + 0.5
        t = jnp.tanh((o_m + BETA) * jax.lax.rsqrt(SIG_S_CONST + FOUR_ETA_SQ * o_s))
        a_s = 0.5 * t + 0.5 - a_m * a_m
    else:  # tanh
        a_m = jnp.tanh(o_m * jax.lax.rsqrt(TANH_M_CONST + FOUR_ETA_SQ * o_s))
        t = jnp.tanh((o_m + BETA_2) * jax.lax.rsqrt(TANH_S_CONST + TANH_S_COEF * o_s))
        a_s = 2.0 * t + 1.0 - a_m * a_m - 2.0 * a_m
    return a_m, a_s


def _npn_nonlin_kernel(activation, om_ref, os_ref, am_ref, as_ref):
    a_m, a_s = _npn_math(om_ref[...], os_ref[...], activation)
    am_ref[...] = a_m
    as_ref[...] = a_s


def gaussian_npn_nonlinearity(o, activation, *,
                              min_pallas_elements=DEFAULT_MIN_PALLAS_ELEMENTS,
                              _tile_rows_override=None):
    """Pallas implementation of GaussianNPNNonLinearity.forward.

    o: tuple (o_m, o_s), identical shapes/dtypes (e.g. NCHW).
    activation: 'sigmoid' | 'tanh' | anything-else (identity).
    """
    o_m, o_s = o
    assert o_m.shape == o_s.shape and o_m.dtype == o_s.dtype

    # Identity path: no kernel launch, zero cost.
    if activation not in ("sigmoid", "tanh"):
        return o_m, o_s

    orig_shape = o_m.shape
    dtype = o_m.dtype
    n = int(np.prod(orig_shape)) if len(orig_shape) else 1

    # Small-input fast path: fused XLA elementwise beats dispatch + plumbing.
    if n < min_pallas_elements:
        return _npn_math(o_m, o_s, activation)

    # Lane-dense (rows, 128) slab, rows rounded only to the 8-row sublane
    # granule (<= 1023 elements of pad; zero pad for the common aligned case).
    rows = _round_up(pl.cdiv(n, LANE), SUBLANE)
    n_slab = rows * LANE

    def to_slab(x):
        x_flat = x.reshape(-1)
        if n_slab != n:
            x_flat = jnp.pad(x_flat, (0, n_slab - n))
        return x_flat.reshape(rows, LANE)

    om2 = to_slab(o_m)
    os2 = to_slab(o_s)

    if _tile_rows_override is not None:
        tile_rows = int(_tile_rows_override)
    else:
        tile_rows = _choose_tile_rows(rows, _num_tensorcores())
    # Ragged last block (if any) is masked by Pallas: OOB reads may be garbage
    # (possibly NaN after rsqrt) but those rows are never written back.
    grid = (int(pl.cdiv(rows, tile_rows)),)

    kernel = functools.partial(_npn_nonlin_kernel, activation)
    spec = pl.BlockSpec((tile_rows, LANE), lambda i: (i, 0))

    itemsize = jnp.dtype(dtype).itemsize
    cost = pl.CostEstimate(
        flops=10 * n_slab,                    # elementwise mul/add/sub
        transcendentals=4 * n_slab,           # 2 rsqrt + 2 tanh per element
        bytes_accessed=4 * n_slab * itemsize, # 2 reads + 2 writes, streamed
    )

    a_m2, a_s2 = pl.pallas_call(
        kernel,
        out_shape=(jax.ShapeDtypeStruct((rows, LANE), dtype),
                   jax.ShapeDtypeStruct((rows, LANE), dtype)),
        grid_spec=pltpu.PrefetchScalarGridSpec(
            num_scalar_prefetch=0,
            grid=grid,
            in_specs=[spec, spec],
            out_specs=[spec, spec],
        ),
        compiler_params=pltpu.CompilerParams(
            dimension_semantics=("parallel",)),
        cost_estimate=cost,
    )(om2, os2)

    if n_slab != n:
        a_m = a_m2.reshape(-1)[:n].reshape(orig_shape)
        a_s = a_s2.reshape(-1)[:n].reshape(orig_shape)
    else:
        a_m = a_m2.reshape(orig_shape)
        a_s = a_s2.reshape(orig_shape)
    return a_m, a_s


# ----------------------------------------------------------------------------
# Reference (mirrors the original PyTorch formulation exactly).
def _kappa_ref(x, const=1.0, alphasq=1.0):
    return 1.0 / jnp.sqrt(const + x * alphasq * ETA_SQ)


def _reference(o, activation):
    o_m, o_s = o
    if activation == "sigmoid":
        a_m = jax.nn.sigmoid(o_m * _kappa_ref(o_s))
        a_s = (jax.nn.sigmoid((o_m + BETA) * ALPHA * _kappa_ref(o_s, alphasq=ALPHA_SQ))
               - a_m ** 2)
        return a_m, a_s
    elif activation == "tanh":
        a_m = 2.0 * jax.nn.sigmoid(o_m * _kappa_ref(o_s, const=0.25)) - 1.0
        a_s = (4.0 * jax.nn.sigmoid((o_m + BETA_2) * ALPHA_2
                                    * _kappa_ref(o_s, alphasq=ALPHA_2_SQ))
               - a_m ** 2 - 2.0 * a_m - 1.0)
        return a_m, a_s
    else:
        return o_m, o_s


if __name__ == "__main__":
    key = jax.random.PRNGKey(0)
    k1, k2, k3, k4, k5, k6 = jax.random.split(key, 6)

    def check(out, ref, atol=1e-5, rtol=1e-5):
        return (np.allclose(np.asarray(out[0]), np.asarray(ref[0]), atol=atol, rtol=rtol)
                and np.allclose(np.asarray(out[1]), np.asarray(ref[1]), atol=atol, rtol=rtol))

    ok = True

    # 1) Small NCHW shape, forced through the Pallas kernel (aligned slab).
    o_m = jax.random.normal(k1, (2, 4, 16, 16), dtype=jnp.float32)
    o_s = jax.nn.softplus(jax.random.normal(k2, (2, 4, 16, 16), dtype=jnp.float32))
    for act in ("sigmoid", "tanh", "linear"):
        out = gaussian_npn_nonlinearity((o_m, o_s), act, min_pallas_elements=0)
        jax.block_until_ready(out)
        ok = ok and check(out, _reference((o_m, o_s), act))

    # 2) Non-aligned element count (exercises the <=1023-element pad path) and
    #    a forced ragged last grid block (tile_rows override).
    o_m2 = jax.random.normal(k3, (2, 4, 17, 16), dtype=jnp.float32)
    o_s2 = jax.nn.softplus(jax.random.normal(k4, (2, 4, 17, 16), dtype=jnp.float32))
    for act in ("sigmoid", "tanh"):
        out = gaussian_npn_nonlinearity((o_m2, o_s2), act, min_pallas_elements=0,
                                        _tile_rows_override=16)
        jax.block_until_ready(out)
        ok = ok and check(out, _reference((o_m2, o_s2), act))

    # 3) Default dispatch: large input -> Pallas kernel with a multi-step grid;
    #    small input -> fused-XLA fast path.
    o_m3 = jax.random.normal(k5, (8, 8, 64, 64), dtype=jnp.float32)
    o_s3 = jax.nn.softplus(jax.random.normal(k6, (8, 8, 64, 64), dtype=jnp.float32))
    for act in ("sigmoid", "tanh"):
        out = gaussian_npn_nonlinearity((o_m3, o_s3), act)
        jax.block_until_ready(out)
        ok = ok and check(out, _reference((o_m3, o_s3), act))
        out = gaussian_npn_nonlinearity((o_m, o_s), act)  # small -> fast path
        jax.block_until_ready(out)
        ok = ok and check(out, _reference((o_m, o_s), act))

    if ok:
        print("KERNEL_OK")
    else:
        print("KERNEL_MISMATCH")
</pallas_src>

<mosaic_0001>
module attributes {stable_mosaic.version = 11 : i64} {
  func.func @_npn_nonlin_kernel(%arg0: i32, %arg1: memref<16x128xf32, #tpu.memory_space<vmem>>, %arg2: memref<16x128xf32, #tpu.memory_space<vmem>>, %arg3: memref<16x128xf32, #tpu.memory_space<vmem>>, %arg4: memref<16x128xf32, #tpu.memory_space<vmem>>) attributes {dimension_semantics = [#tpu.dimension_semantics<parallel>], iteration_bounds = array<i64: 1>, scalar_prefetch = 0 : i64, scratch_operands = 0 : i64, tpu.core_type = #tpu.core_type<tc>, window_params = [{transform_indices = @transform_0, window_bounds = array<i64: 16, 128>}, {transform_indices = @transform_1, window_bounds = array<i64: 16, 128>}, {transform_indices = @transform_2, window_bounds = array<i64: 16, 128>}, {transform_indices = @transform_3, window_bounds = array<i64: 16, 128>}]} {
    %c0 = arith.constant 0 : index
    %c0_0 = arith.constant 0 : index
    %0 = vector.load %arg1[%c0, %c0_0] : memref<16x128xf32, #tpu.memory_space<vmem>>, vector<16x128xf32>
    %c0_1 = arith.constant 0 : index
    %c0_2 = arith.constant 0 : index
    %1 = vector.load %arg2[%c0_1, %c0_2] : memref<16x128xf32, #tpu.memory_space<vmem>>, vector<16x128xf32>
    %cst = arith.constant 1.57079637 : f32
    %2 = vector.broadcast %cst : f32 to vector<16x128xf32>
    %3 = arith.mulf %2, %1 : vector<16x128xf32>
    %cst_3 = arith.constant 4.000000e+00 : f32
    %4 = vector.broadcast %cst_3 : f32 to vector<16x128xf32>
    %5 = arith.addf %4, %3 : vector<16x128xf32>
    %6 = math.rsqrt %5 : vector<16x128xf32>
    %7 = arith.mulf %0, %6 : vector<16x128xf32>
    %8 = math.tanh %7 : vector<16x128xf32>
    %cst_4 = arith.constant 5.000000e-01 : f32
    %9 = vector.broadcast %cst_4 : f32 to vector<16x128xf32>
    %10 = arith.mulf %9, %8 : vector<16x128xf32>
    %cst_5 = arith.constant 5.000000e-01 : f32
    %11 = vector.broadcast %cst_5 : f32 to vector<16x128xf32>
    %12 = arith.addf %10, %11 : vector<16x128xf32>
    %cst_6 = arith.constant -0.881373584 : f32
    %13 = vector.broadcast %cst_6 : f32 to vector<16x128xf32>
    %14 = arith.addf %0, %13 : vector<16x128xf32>
    %cst_7 = arith.constant 1.57079637 : f32
    %15 = vector.broadcast %cst_7 : f32 to vector<16x128xf32>
    %16 = arith.mulf %15, %1 : vector<16x128xf32>
    %cst_8 = arith.constant 2.91421366 : f32
    %17 = vector.broadcast %cst_8 : f32 to vector<16x128xf32>
    %18 = arith.addf %17, %16 : vector<16x128xf32>
    %19 = math.rsqrt %18 : vector<16x128xf32>
    %20 = arith.mulf %14, %19 : vector<16x128xf32>
    %21 = math.tanh %20 : vector<16x128xf32>
    %cst_9 = arith.constant 5.000000e-01 : f32
    %22 = vector.broadcast %cst_9 : f32 to vector<16x128xf32>
    %23 = arith.mulf %22, %21 : vector<16x128xf32>
    %cst_10 = arith.constant 5.000000e-01 : f32
    %24 = vector.broadcast %cst_10 : f32 to vector<16x128xf32>
    %25 = arith.addf %23, %24 : vector<16x128xf32>
    %26 = arith.mulf %12, %12 : vector<16x128xf32>
    %27 = arith.subf %25, %26 : vector<16x128xf32>
    %c0_11 = arith.constant 0 : index
    %c0_12 = arith.constant 0 : index
    %28 = vector.load %arg3[%c0_11, %c0_12] : memref<16x128xf32, #tpu.memory_space<vmem>>, vector<16x128xf32>
    tpu.vector_store %arg3[%c0_11, %c0_12], %12 {strides = array<i32>} : memref<16x128xf32, #tpu.memory_space<vmem>>, vector<16x128xf32>,
    %c0_13 = arith.constant 0 : index
    %c0_14 = arith.constant 0 : index
    %29 = vector.load %arg4[%c0_13, %c0_14] : memref<16x128xf32, #tpu.memory_space<vmem>>, vector<16x128xf32>
    tpu.vector_store %arg4[%c0_13, %c0_14], %27 {strides = array<i32>} : memref<16x128xf32, #tpu.memory_space<vmem>>, vector<16x128xf32>,
    return
  }
  func.func @transform_0(%arg0: i32) -> (i32, i32) {
    %c0_i32 = arith.constant 0 : i32
    %c0_i32_0 = arith.constant 0 : i32
    return %arg0, %c0_i32 : i32, i32
  }
  func.func @transform_1(%arg0: i32) -> (i32, i32) {
    %c0_i32 = arith.constant 0 : i32
    %c0_i32_0 = arith.constant 0 : i32
    return %arg0, %c0_i32 : i32, i32
  }
  func.func @transform_2(%arg0: i32) -> (i32, i32) {
    %c0_i32 = arith.constant 0 : i32
    %c0_i32_0 = arith.constant 0 : i32
    return %arg0, %c0_i32 : i32, i32
  }
  func.func @transform_3(%arg0: i32) -> (i32, i32) {
    %c0_i32 = arith.constant 0 : i32
    %c0_i32_0 = arith.constant 0 : i32
    return %arg0, %c0_i32 : i32, i32
  }
}

</mosaic_0001>

<bundles_post_ra>
// kernel: tpu_custom_call.1
= control target key start
LH: loop header
LB: loop body
LE: loop exit
PB: predicated region body
PF: predicated region fallthrough
CT: control target
= control target key end

     0   :  { %9 = vsyncpa [#allocation3], 0  ;;  %s277_s0 = inlined_call_operand.hbm [shape: f32[16,128], index: 0, kind: input, shape index: {}]   ;;  %s278_s1 = inlined_call_operand.hbm [shape: f32[16,128], index: 1, kind: input, shape index: {}]   ;;  %s279_s2 = inlined_call_operand.hbm [shape: f32[16,128], index: 2, kind: output, shape index: {0}]   ;;  %s280_s3 = inlined_call_operand.hbm [shape: f32[16,128], index: 3, kind: output, shape index: {1}]  }
   0x1   :  { %10 = vsyncpa [#allocation6], 0 }
   0x2   :  { %11 = vsyncpa [#allocation4], 0 }
   0x3   :  { %12 = vsyncpa [#allocation9], 0  ;;  %s227_s12 = smov [#allocation2]  }
   0x4   :  { %s18_s13 = sshll.u32 %s227_s12, 4  ;;  %s19_s13 = int_to_ptr.vmem [resolvable:$true] %s18_s13 }
   0x5   :  { %s147_s14 = scalar_lea.vmem %s19_s13, 256  ;;  %p152_p1 = scmp.lt.s32.totalorder %s19_s13, %s19_s13 }
   0x6   :  { %p148_p0 = scmp.ne.s32.totalorder %s19_s13, %s147_s14  ;;  %p153_p2 = scmp.lt.s32.totalorder %s147_s14, %s147_s14 }
   0x8   :  { %p154_p3 = por %p153_p2, %p152_p1 }
   0xa   :  { %p155_p4 = pnand %p154_p3, %p148_p0 }
   0xc   :  { %158 = shalt.err (!%p155_p4)
}
   0xd   :  { %s228_s15 = smov 128   ;;  %s229_s16 = smov 8  }
   0xe   :  { %24 = dma.hbm_to_vmem [thread:$0]  %s277_s0, 256, %s19_s13, [#allocation3], %s228_s15, %s228_s15, %s229_s16  }
   0xf   :  { %s230_s19 = smov [#allocation5]  }
  0x10   :  { %s30_s20 = sshll.u32 %s230_s19, 4  ;;  %s31_s20 = int_to_ptr.vmem [resolvable:$true] %s30_s20 }
  0x11   :  { %s167_s21 = scalar_lea.vmem %s31_s20, 256  ;;  %p172_p6 = scmp.lt.s32.totalorder %s31_s20, %s31_s20 }
  0x12   :  { %p168_p5 = scmp.ne.s32.totalorder %s31_s20, %s167_s21  ;;  %p173_p7 = scmp.lt.s32.totalorder %s167_s21, %s167_s21 }
  0x14   :  { %p174_p8 = por %p173_p7, %p172_p6 }
  0x16   :  { %p175_p9 = pnand %p174_p8, %p168_p5 }
  0x18   :  { %178 = shalt.err (!%p175_p9)
}
  0x19   :  { %36 = dma.hbm_to_vmem [thread:$0]  %s278_s1, 256, %s31_s20, [#allocation6], %s228_s15, %s228_s15, %s229_s16  }
  0x1a   :  { %219 = dma.done.wait [#allocation3], 256  }
  0x1b   :  { %220 = vsyncadd [#allocation3], 4294967040 }
  0x1c   :  { %221 = dma.done.wait [#allocation6], 256  }
  0x1d   :  { %222 = vsyncadd [#allocation6], 4294967040  ;;  %v45_v0 = vld [vmem:[#allocation5] sm:$0xff]  ;;  %v46_v2 = vld [vmem:[#allocation5 + $0x8] sm:$0xff]  ;;  %s231_s0 = smov [#allocation7]   ;;  %s232_s24 = smov [#allocation8]  }
  0x1e   :  { %v47_v1 = vmul.f32 1.5707964, %v45_v0  ;;  %v48_v3 = vmul.f32 1.5707964, %v46_v2  ;;  %v43_v8 = vld [vmem:[#allocation2] sm:$0xff]  ;;  %v44_v9 = vld [vmem:[#allocation2 + $0x8] sm:$0xff] }
  0x1f   :  { %v61_v10 = vadd.f32 -0.8813736, %v43_v8  ;;  %v62_v12 = vadd.f32 -0.8813736, %v44_v9  ;;  %s88_s1 = sshll.u32 %s231_s0, 4  ;;  %s100_s25 = sshll.u32 %s232_s24, 4  ;;  %s89_s1 = int_to_ptr.vmem [resolvable:$true] %s88_s1  ;;  %s101_s25 = int_to_ptr.vmem [resolvable:$true] %s100_s25 }
  0x20   :  { %v49_v4 = vadd.f32 4.0, %v47_v1  ;;  %v63_v5 = vadd.f32 2.9142137, %v47_v1  ;;  %v50_v6 = vadd.f32 4.0, %v48_v3  ;;  %v64_v7 = vadd.f32 2.9142137, %v48_v3  ;;  %p184_p11 = scmp.lt.s32.totalorder %s89_s1, %s89_s1 }
  0x21   :  { %s179_s26 = scalar_lea.vmem %s89_s1, 256 }
  0x22   :  { %123 = vrsqrt.f32 %v49_v4  ;;  %p180_p10 = scmp.ne.s32.totalorder %s89_s1, %s179_s26  ;;  %p185_p12 = scmp.lt.s32.totalorder %s179_s26, %s179_s26 }
  0x23   :  { %125 = vrsqrt.f32 %v50_v6 }
  0x24   :  { %127 = vrsqrt.f32 %v63_v5  ;;  %p186_p13 = por %p185_p12, %p184_p11 }
  0x25   :  { %129 = vrsqrt.f32 %v64_v7 }
  0x26   :  { %p187_p0 = pnand %p186_p13, %p180_p10 }
  0x2f   :  { %v124_v11 = vpop.eup %123 }
  0x30   :  { %v126_v13 = vpop.eup %125  ;;  %v53_v14 = vmul.f32 %v124_v11, %v43_v8 }
  0x31   :  { %v128_v15 = vpop.eup %127  ;;  %v54_v16 = vmul.f32 %v126_v13, %v44_v9 }
  0x32   :  { %v130_v17 = vpop.eup %129  ;;  %131 = vtanh.f32 %v53_v14  ;;  %v67_v18 = vmul.f32 %v128_v15, %v61_v10 }
  0x33   :  { %133 = vtanh.f32 %v54_v16  ;;  %v68_v19 = vmul.f32 %v130_v17, %v62_v12 }
  0x34   :  { %135 = vtanh.f32 %v67_v18 }
  0x35   :  { %137 = vtanh.f32 %v68_v19 }
  0x3f   :  { %v132_v20 = vpop.eup %131 }
  0x40   :  { %v134_v21 = vpop.eup %133  ;;  %v57_v22 = vmul.f32 0.5, %v132_v20 }
  0x41   :  { %v136_v23 = vpop.eup %135  ;;  %v58_v24 = vmul.f32 0.5, %v134_v21 }
  0x42   :  { %v138_v25 = vpop.eup %137  ;;  %v59_v26 = vadd.f32 0.5, %v57_v22  ;;  %v71_v27 = vmul.f32 0.5, %v136_v23 }
  0x43   :  { %v60_v28 = vadd.f32 0.5, %v58_v24  ;;  %v72_v29 = vmul.f32 0.5, %v138_v25 }
  0x44   :  { %79 = vst [vmem:[#allocation7] sm:$0xff] %v59_v26  ;;  %v73_v30 = vadd.f32 0.5, %v71_v27  ;;  %v75_v31 = vmul.f32 %v59_v26, %v59_v26 }
  0x45   :  { %80 = vst [vmem:[#allocation7 + $0x8] sm:$0xff] %v60_v28  ;;  %v74_v32 = vadd.f32 0.5, %v72_v29  ;;  %v76_v33 = vmul.f32 %v60_v28, %v60_v28 }
  0x46   :  { %v77_v34 = vsub.f32 %v73_v30, %v75_v31 }
  0x47   :  { %190 = shalt.err (!%p187_p0)
}
  0x48   :  { %94 = dma.vmem_to_hbm [thread:$0]  %s89_s1, 256, %s279_s2, [#allocation4], %s228_s15, %s228_s15, %s229_s16   ;;  %v78_v35 = vsub.f32 %v74_v32, %v76_v33  ;;  %81 = vst [vmem:[#allocation8] sm:$0xff] %v77_v34 }
  0x49   :  { %s199_s29 = scalar_lea.vmem %s101_s25, 256  ;;  %p204_p2 = scmp.lt.s32.totalorder %s101_s25, %s101_s25 }
  0x4a   :  { %82 = vst [vmem:[#allocation8 + $0x8] sm:$0xff] %v78_v35  ;;  %p200_p1 = scmp.ne.s32.totalorder %s101_s25, %s199_s29  ;;  %p205_p3 = scmp.lt.s32.totalorder %s199_s29, %s199_s29 }
  0x4c   :  { %p206_p4 = por %p205_p3, %p204_p2 }
  0x4e   :  { %p207_p5 = pnand %p206_p4, %p200_p1 }
  0x50   :  { %210 = shalt.err (!%p207_p5)
}
  0x51   :  { %106 = dma.vmem_to_hbm [thread:$0]  %s101_s25, 256, %s280_s3, [#allocation9], %s228_s15, %s228_s15, %s229_s16  }
  0x52   :  { %223 = dma.done.wait [#allocation4], 256  }
  0x53   :  { %224 = vsyncadd [#allocation4], 4294967040 }
  0x54   :  { %225 = dma.done.wait [#allocation9], 256  }
  0x55   :  { %226 = vsyncadd [#allocation9], 4294967040 }
  0x56   :  { %113 = vsyncpa [#allocation3], 1 }
  0x57   :  { %114 = vsyncpa [#allocation6], 1 }
  0x58   :  { %115 = vsyncpa [#allocation4], 1 }
  0x59   :  { %116 = vsyncpa [#allocation9], 1 }

</bundles_post_ra>
